<compile_context>
chip_gen: v7x
topology: tpu7x:2x2x1
jax: 0.10.0
libtpu: 0.0.40
codegen_flags: <defaults>
</compile_context>

<pallas_src>
import functools

import jax
import jax.numpy as jnp
import numpy as np
from jax.experimental import pallas as pl
from jax.experimental.pallas import tpu as pltpu


def _round_up(x, m):
    return ((x + m - 1) // m) * m


def _pick_row_tile(b_pad, max_tile=256):
    """Largest tile in {512, 256, 128} that divides b_pad, capped at max_tile,
    halved (down to 128) so the grid has >= 2 steps whenever possible."""
    tm = 128
    for cand in (512, 256):
        if cand <= max_tile and b_pad % cand == 0:
            tm = cand
            break
    while tm > 128 and b_pad // tm < 2:
        tm //= 2
    return tm


# ------------------------------ Pallas kernel ------------------------------ #
def _dnn_kernel(idx_ref, w1t_ref, b1_ref, w2t_ref, b2_ref, w3_ref, b3_ref,
                out_ref, *, apply_sigmoid):
    # idx_ref : (F, TM) int32   global ids (per-field offsets already added)
    # w1t_ref : (H, V)  f32     embedding table folded into layer 1, transposed
    # b1_ref  : (H, 1)  f32
    # w2t_ref : (H, H)  f32     b2_ref : (H, 1)
    # w3_ref  : (H, 1)  f32     b3_ref : (1, 1)
    # out_ref : (1, TM) f32     lane-dense sigmoid(logit) or logit
    idx = idx_ref[...]                                    # (F, TM)
    num_fields, tm = idx.shape
    vocab = w1t_ref.shape[1]

    # Multi-hot (V, TM): exactly one hit per field (fields occupy disjoint
    # global-row ranges), built with VPU compares + ORs on a sublane iota.
    row = jax.lax.broadcasted_iota(jnp.int32, (vocab, tm), 0)
    hit = row == idx[0:1, :]
    for f in range(1, num_fields):
        hit = jnp.logical_or(hit, row == idx[f:f + 1, :])
    mh = hit.astype(jnp.float32)                          # (V, TM)

    # Embedding gather + layer 1 as a single MXU matmul: (H, V) @ (V, TM).
    h = jnp.dot(w1t_ref[...], mh, preferred_element_type=jnp.float32) + b1_ref[...]
    h = jnp.maximum(h, 0.0)
    h = jnp.dot(w2t_ref[...], h, preferred_element_type=jnp.float32) + b2_ref[...]
    h = jnp.maximum(h, 0.0)

    # Final (H -> 1) layer: VPU multiply + sublane reduce -> lane-dense (1, TM).
    z = jnp.sum(h * w3_ref[...], axis=0, keepdims=True) + b3_ref[...]
    out_ref[...] = jax.nn.sigmoid(z) if apply_sigmoid else z


# ------------------------------- call wrapper ------------------------------ #
def dnn_forward_pallas(x_idx, offsets, w1_fold_t, b1_col, w2_t, b2_col, w3_col,
                       b3, *, apply_sigmoid=True, row_tile=256):
    """Fused embedding-gather + 3-layer MLP (+ optional sigmoid).

    x_idx: (B, F) int32 raw per-field feature ids.  Returns (B,) float32.
    """
    B, F = x_idx.shape
    H, V = w1_fold_t.shape

    # Pre-add the per-field offsets (one XLA add) and transpose so the batch
    # dimension lives on lanes inside the kernel.
    off = jnp.asarray(offsets, dtype=jnp.int32)
    gidx = (x_idx.astype(jnp.int32) + off[None, :]).T     # (F, B)

    B_pad = _round_up(B, 128)                             # waste bounded < 128 rows
    tm = _pick_row_tile(B_pad, int(row_tile))
    if B_pad != B:
        gidx = jnp.pad(gidx, ((0, 0), (0, B_pad - B)))    # id-0 cols, sliced off
    grid = (B_pad // tm,)

    kernel = functools.partial(_dnn_kernel, apply_sigmoid=bool(apply_sigmoid))

    cost = pl.CostEstimate(
        flops=int(2 * B_pad * (H * V + H * H + H)),
        transcendentals=int(B_pad if apply_sigmoid else 0),
        bytes_accessed=int(B_pad * (F + 1) * 4 + 4 * (H * V + H * H + 3 * H + 1)),
    )

    const = lambda shape: pl.BlockSpec(shape, lambda i: tuple(0 for _ in shape))

    out = pl.pallas_call(
        kernel,
        out_shape=jax.ShapeDtypeStruct((1, B_pad), jnp.float32),
        grid=grid,
        in_specs=[
            pl.BlockSpec((F, tm), lambda i: (0, i)),      # ids: pipelined per tile
            const((H, V)), const((H, 1)),                 # folded W1 / b1 (VMEM-resident)
            const((H, H)), const((H, 1)),                 # W2^T / b2
            const((H, 1)), const((1, 1)),                 # w3 / b3
        ],
        out_specs=pl.BlockSpec((1, tm), lambda i: (0, i)),  # lane-dense output
        compiler_params=pltpu.CompilerParams(
            dimension_semantics=("parallel",),            # megacore / v7x 2-TC split
            vmem_limit_bytes=32 * 1024 * 1024,            # fits all of v5e/v6e/v7x
        ),
        cost_estimate=cost,
    )(gidx, w1_fold_t, b1_col, w2_t, b2_col, w3_col, b3)
    return out[0, :B]                                      # (B,)


# ---------------------------- model (params + glue) ------------------------ #
class DNNModelPallas:
    def __init__(self, field_dims, embed_dim, key):
        self.field_dims = tuple(int(d) for d in field_dims)
        self.embed_dim = int(embed_dim)
        self.num_fields = len(self.field_dims)
        self.embed_output_dim = self.num_fields * self.embed_dim

        # torchfm FeaturesEmbedding: one table of sum(field_dims) rows with
        # static per-field offsets.
        off = np.concatenate(([0], np.cumsum(self.field_dims)[:-1]))
        self.offsets = tuple(int(o) for o in off)
        self.offsets_arr = jnp.asarray(off, dtype=jnp.int32)

        ks = jax.random.split(key, 4)
        total = int(sum(self.field_dims))
        self.emb_table = 0.1 * jax.random.normal(
            ks[0], (total, self.embed_dim), dtype=jnp.float32)

        def lin(k, fan_in, fan_out):
            bound = 1.0 / np.sqrt(fan_in)
            kw, kb = jax.random.split(k)
            w = jax.random.uniform(kw, (fan_in, fan_out), jnp.float32, -bound, bound)
            b = jax.random.uniform(kb, (1, fan_out), jnp.float32, -bound, bound)
            return w, b

        d_in = self.embed_output_dim
        self.w1, self.b1 = lin(ks[1], d_in, 32)
        self.w2, self.b2 = lin(ks[2], 32, 32)
        self.w3, self.b3 = lin(ks[3], 32, 1)               # w3: (32, 1), b3: (1, 1)

        # Fold the embedding table into layer 1: W1'[g] = tbl[g] @ W1[field(g)],
        # so in-kernel gather + layer-1 become one multi-hot matmul.
        parts = []
        for f in range(self.num_fields):
            o, d = self.offsets[f], self.field_dims[f]
            w1_blk = self.w1[f * self.embed_dim:(f + 1) * self.embed_dim, :]
            parts.append(self.emb_table[o:o + d] @ w1_blk)  # (d, 32)
        self.w1_fold_t = jnp.concatenate(parts, axis=0).T   # (32, V)

        # Transposed / column-form params for the lane-dense (batch-on-lanes) kernel.
        self.b1_col = self.b1.T                              # (32, 1)
        self.w2_t = self.w2.T                                # (32, 32)
        self.b2_col = self.b2.T                              # (32, 1)

    def __call__(self, x, sigmoid_output=True):
        out = dnn_forward_pallas(
            x.astype(jnp.int32), self.offsets,
            self.w1_fold_t, self.b1_col, self.w2_t, self.b2_col, self.w3, self.b3,
            apply_sigmoid=sigmoid_output)                    # (B,)
        if sigmoid_output:
            return out                                        # matches sigmoid(x.squeeze(1))
        return out[:, None]                                   # (B, 1) pre-sigmoid logits

    # Pure-JAX reference (straight port of the torch forward; numerical check only).
    def reference(self, x, sigmoid_output=True):
        idx = x.astype(jnp.int32) + self.offsets_arr[None, :]
        h = self.emb_table[idx].reshape(-1, self.embed_output_dim)
        h = jnp.maximum(h @ self.w1 + self.b1, 0.0)
        h = jnp.maximum(h @ self.w2 + self.b2, 0.0)
        z = h @ self.w3 + self.b3
        return jax.nn.sigmoid(z[:, 0]) if sigmoid_output else z


# ------------------------------------ main --------------------------------- #
if __name__ == "__main__":
    key = jax.random.PRNGKey(0)
    field_dims = (16, 16, 16, 16)     # 4 fields, V = 64
    embed_dim = 8                     # embed_output_dim = 32
    batch = 8

    model = DNNModelPallas(field_dims, embed_dim, key)

    x = jax.random.randint(jax.random.PRNGKey(1), (batch, len(field_dims)),
                           0, min(field_dims), dtype=jnp.int32)

    probs = jax.block_until_ready(model(x))                           # (B,)
    logits = jax.block_until_ready(model(x, sigmoid_output=False))    # (B, 1)

    ref_p = model.reference(x)
    ref_z = model.reference(x, sigmoid_output=False)

    assert probs.shape == (batch,)
    assert logits.shape == (batch, 1)
    # Tolerance covers the different f32-matmul pass decomposition between the
    # folded (table-into-W1) kernel path and the gather-then-matmul reference.
    np.testing.assert_allclose(np.asarray(probs), np.asarray(ref_p),
                               rtol=2e-3, atol=2e-3)
    np.testing.assert_allclose(np.asarray(logits), np.asarray(ref_z),
                               rtol=2e-3, atol=2e-3)

    print("KERNEL_OK")
</pallas_src>

<mosaic_0001>
module attributes {stable_mosaic.version = 11 : i64} {
  func.func @_dnn_kernel(%arg0: i32, %arg1: memref<4x128xi32, #tpu.memory_space<vmem>>, %arg2: memref<32x64xf32, #tpu.memory_space<vmem>>, %arg3: memref<32x1xf32, #tpu.memory_space<vmem>>, %arg4: memref<32x32xf32, #tpu.memory_space<vmem>>, %arg5: memref<32x1xf32, #tpu.memory_space<vmem>>, %arg6: memref<32x1xf32, #tpu.memory_space<vmem>>, %arg7: memref<1x1xf32, #tpu.memory_space<vmem>>, %arg8: memref<1x128xf32, #tpu.memory_space<vmem>>) attributes {dimension_semantics = [#tpu.dimension_semantics<parallel>], iteration_bounds = array<i64: 1>, scalar_prefetch = 0 : i64, scratch_operands = 0 : i64, tpu.core_type = #tpu.core_type<tc>, window_params = [{transform_indices = @transform_0, window_bounds = array<i64: 4, 128>}, {pipeline_mode = #tpu.pipeline_mode<synchronous>, transform_indices = @transform_1, window_bounds = array<i64: 32, 64>}, {pipeline_mode = #tpu.pipeline_mode<synchronous>, transform_indices = @transform_2, window_bounds = array<i64: 32, 1>}, {pipeline_mode = #tpu.pipeline_mode<synchronous>, transform_indices = @transform_3, window_bounds = array<i64: 32, 32>}, {pipeline_mode = #tpu.pipeline_mode<synchronous>, transform_indices = @transform_4, window_bounds = array<i64: 32, 1>}, {pipeline_mode = #tpu.pipeline_mode<synchronous>, transform_indices = @transform_5, window_bounds = array<i64: 32, 1>}, {pipeline_mode = #tpu.pipeline_mode<synchronous>, transform_indices = @transform_6, window_bounds = array<i64: 1, 1>}, {transform_indices = @transform_7, window_bounds = array<i64: 1, 128>}]} {
    %c0 = arith.constant 0 : index
    %c0_0 = arith.constant 0 : index
    %0 = vector.load %arg1[%c0, %c0_0] : memref<4x128xi32, #tpu.memory_space<vmem>>, vector<4x128xi32>
    %1 = tpu.iota {dimensions = array<i32: 0>} : vector<64x128xi32>
    %2 = vector.extract_strided_slice %0 {offsets = [0, 0], sizes = [1, 128], strides = [1, 1]} : vector<4x128xi32> to vector<1x128xi32>
    %3 = vector.broadcast %2 : vector<1x128xi32> to vector<64x128xi32>
    %4 = arith.cmpi eq, %1, %3 : vector<64x128xi32>
    %5 = vector.extract_strided_slice %0 {offsets = [1, 0], sizes = [1, 128], strides = [1, 1]} : vector<4x128xi32> to vector<1x128xi32>
    %6 = vector.broadcast %5 : vector<1x128xi32> to vector<64x128xi32>
    %7 = arith.cmpi eq, %1, %6 : vector<64x128xi32>
    %8 = arith.ori %4, %7 : vector<64x128xi1>
    %9 = vector.extract_strided_slice %0 {offsets = [2, 0], sizes = [1, 128], strides = [1, 1]} : vector<4x128xi32> to vector<1x128xi32>
    %10 = vector.broadcast %9 : vector<1x128xi32> to vector<64x128xi32>
    %11 = arith.cmpi eq, %1, %10 : vector<64x128xi32>
    %12 = arith.ori %8, %11 : vector<64x128xi1>
    %13 = vector.extract_strided_slice %0 {offsets = [3, 0], sizes = [1, 128], strides = [1, 1]} : vector<4x128xi32> to vector<1x128xi32>
    %14 = vector.broadcast %13 : vector<1x128xi32> to vector<64x128xi32>
    %15 = arith.cmpi eq, %1, %14 : vector<64x128xi32>
    %16 = arith.ori %12, %15 : vector<64x128xi1>
    %17 = arith.extui %16 : vector<64x128xi1> to vector<64x128xi32>
    %18 = arith.sitofp %17 : vector<64x128xi32> to vector<64x128xf32>
    %c0_1 = arith.constant 0 : index
    %c0_2 = arith.constant 0 : index
    %19 = vector.load %arg2[%c0_1, %c0_2] : memref<32x64xf32, #tpu.memory_space<vmem>>, vector<32x64xf32>
    %cst = arith.constant dense<0.000000e+00> : vector<32x128xf32>
    %20 = tpu.matmul %19, %18, %cst {dimension_numbers = #tpu.dot_dimension_numbers<[1], [0], [0], [1], [0, 0, 1, 1], [], []>} : vector<32x64xf32>, vector<64x128xf32>, vector<32x128xf32> -> vector<32x128xf32>
    %c0_3 = arith.constant 0 : index
    %c0_4 = arith.constant 0 : index
    %21 = vector.load %arg3[%c0_3, %c0_4] : memref<32x1xf32, #tpu.memory_space<vmem>>, vector<32x1xf32>
    %22 = vector.broadcast %21 : vector<32x1xf32> to vector<32x128xf32>
    %23 = arith.addf %20, %22 : vector<32x128xf32>
    %cst_5 = arith.constant 0.000000e+00 : f32
    %24 = vector.broadcast %cst_5 : f32 to vector<32x128xf32>
    %25 = arith.maximumf %23, %24 : vector<32x128xf32>
    %c0_6 = arith.constant 0 : index
    %c0_7 = arith.constant 0 : index
    %26 = vector.load %arg4[%c0_6, %c0_7] : memref<32x32xf32, #tpu.memory_space<vmem>>, vector<32x32xf32>
    %cst_8 = arith.constant dense<0.000000e+00> : vector<32x128xf32>
    %27 = tpu.matmul %26, %25, %cst_8 {dimension_numbers = #tpu.dot_dimension_numbers<[1], [0], [0], [1], [0, 0, 1, 1], [], []>} : vector<32x32xf32>, vector<32x128xf32>, vector<32x128xf32> -> vector<32x128xf32>
    %c0_9 = arith.constant 0 : index
    %c0_10 = arith.constant 0 : index
    %28 = vector.load %arg5[%c0_9, %c0_10] : memref<32x1xf32, #tpu.memory_space<vmem>>, vector<32x1xf32>
    %29 = vector.broadcast %28 : vector<32x1xf32> to vector<32x128xf32>
    %30 = arith.addf %27, %29 : vector<32x128xf32>
    %cst_11 = arith.constant 0.000000e+00 : f32
    %31 = vector.broadcast %cst_11 : f32 to vector<32x128xf32>
    %32 = arith.maximumf %30, %31 : vector<32x128xf32>
    %c0_12 = arith.constant 0 : index
    %c0_13 = arith.constant 0 : index
    %33 = vector.load %arg6[%c0_12, %c0_13] : memref<32x1xf32, #tpu.memory_space<vmem>>, vector<32x1xf32>
    %34 = vector.broadcast %33 : vector<32x1xf32> to vector<32x128xf32>
    %35 = arith.mulf %32, %34 : vector<32x128xf32>
    %cst_14 = arith.constant dense<0.000000e+00> : vector<128xf32>
    %36 = vector.multi_reduction <add>, %35, %cst_14 [0] : vector<32x128xf32> to vector<128xf32>
    %37 = vector.shape_cast %36 : vector<128xf32> to vector<1x128xf32>
    %c0_15 = arith.constant 0 : index
    %c0_16 = arith.constant 0 : index
    %38 = vector.load %arg7[%c0_15, %c0_16] : memref<1x1xf32, #tpu.memory_space<vmem>>, vector<1x1xf32>
    %39 = vector.broadcast %38 : vector<1x1xf32> to vector<1x128xf32>
    %40 = arith.addf %37, %39 : vector<1x128xf32>
    %41 = arith.negf %40 : vector<1x128xf32>
    %42 = math.exp %41 : vector<1x128xf32>
    %cst_17 = arith.constant 1.000000e+00 : f32
    %43 = vector.broadcast %cst_17 : f32 to vector<1x128xf32>
    %44 = arith.addf %43, %42 : vector<1x128xf32>
    %45 = arith.divf %43, %44 : vector<1x128xf32>
    %c0_18 = arith.constant 0 : index
    %c0_19 = arith.constant 0 : index
    %46 = vector.load %arg8[%c0_18, %c0_19] : memref<1x128xf32, #tpu.memory_space<vmem>>, vector<1x128xf32>
    tpu.vector_store %arg8[%c0_18, %c0_19], %45 {strides = array<i32>} : memref<1x128xf32, #tpu.memory_space<vmem>>, vector<1x128xf32>,
    return
  }
  func.func @transform_0(%arg0: i32) -> (i32, i32) {
    %c0_i32 = arith.constant 0 : i32
    %c0_i32_0 = arith.constant 0 : i32
    return %c0_i32, %arg0 : i32, i32
  }
  func.func @transform_1(%arg0: i32) -> (i32, i32) {
    %c0_i32 = arith.constant 0 : i32
    %c0_i32_0 = arith.constant 0 : i32
    %c0_i32_1 = arith.constant 0 : i32
    return %c0_i32, %c0_i32_0 : i32, i32
  }
  func.func @transform_2(%arg0: i32) -> (i32, i32) {
    %c0_i32 = arith.constant 0 : i32
    %c0_i32_0 = arith.constant 0 : i32
    %c0_i32_1 = arith.constant 0 : i32
    return %c0_i32, %c0_i32_0 : i32, i32
  }
  func.func @transform_3(%arg0: i32) -> (i32, i32) {
    %c0_i32 = arith.constant 0 : i32
    %c0_i32_0 = arith.constant 0 : i32
    %c0_i32_1 = arith.constant 0 : i32
    return %c0_i32, %c0_i32_0 : i32, i32
  }
  func.func @transform_4(%arg0: i32) -> (i32, i32) {
    %c0_i32 = arith.constant 0 : i32
    %c0_i32_0 = arith.constant 0 : i32
    %c0_i32_1 = arith.constant 0 : i32
    return %c0_i32, %c0_i32_0 : i32, i32
  }
  func.func @transform_5(%arg0: i32) -> (i32, i32) {
    %c0_i32 = arith.constant 0 : i32
    %c0_i32_0 = arith.constant 0 : i32
    %c0_i32_1 = arith.constant 0 : i32
    return %c0_i32, %c0_i32_0 : i32, i32
  }
  func.func @transform_6(%arg0: i32) -> (i32, i32) {
    %c0_i32 = arith.constant 0 : i32
    %c0_i32_0 = arith.constant 0 : i32
    %c0_i32_1 = arith.constant 0 : i32
    return %c0_i32, %c0_i32_0 : i32, i32
  }
  func.func @transform_7(%arg0: i32) -> (i32, i32) {
    %c0_i32 = arith.constant 0 : i32
    %c0_i32_0 = arith.constant 0 : i32
    return %c0_i32, %arg0 : i32, i32
  }
}

</mosaic_0001>

<bundles_post_ra>
// kernel: tpu_custom_call.1
= control target key start
LH: loop header
LB: loop body
LE: loop exit
PB: predicated region body
PF: predicated region fallthrough
CT: control target
= control target key end

     0   :  { %s804_s0 = inlined_call_operand.vmem [shape: s32[4,128], index: 0, kind: input, shape index: {}]   ;;  %s805_s1 = inlined_call_operand.vmem [shape: f32[32,64], index: 1, kind: input, shape index: {}]   ;;  %s806_s2 = inlined_call_operand.vmem [shape: f32[32,1], index: 2, kind: input, shape index: {}]   ;;  %s807_s3 = inlined_call_operand.vmem [shape: f32[32,32], index: 3, kind: input, shape index: {}]   ;;  %s808_s4 = inlined_call_operand.vmem [shape: f32[32,1], index: 4, kind: input, shape index: {}]   ;;  %s809_s5 = inlined_call_operand.vmem [shape: f32[32,1], index: 5, kind: input, shape index: {}]   ;;  %s810_s6 = inlined_call_operand.<no memory space> [shape: f32[1,1], index: 6, kind: input, shape index: {}]   ;;  %s811_s7 = inlined_call_operand.hbm [shape: f32[1,128], index: 7, kind: output, shape index: {}]  }
   0x1   :  { %v12_v0 = vstv %s810_s6 }
   0x2   :  { %13 = vst [vmem:[#allocation2] sm:$0x1] %v12_v0 }
   0x3   :  { %v30_v1 = vlaneseq  ;;  %v127_v2 = vld [vmem:[%s805_s1] sm:$0xff]  ;;  %vm812_vm0 = vcmask 523264   ;;  %v594_v4 = vmov 0   ;;  %v133_v6 = vld [vmem:[%s806_s2 + $0x10] sm:$0xff]  ;;  %v132_v12 = vld [vmem:[%s806_s2 + $0x8] sm:$0xff] }
   0x4   :  { %517 = vmatprep.mubr.msk.f32.mxu0 %vm812_vm0, %v127_v2  ;;  %564 = vset.pattern.permute.xlu0 %v594_v4  ;;  %v131_v5 = vld [vmem:[%s806_s2] sm:$0xff]  ;;  %v134_v13 = vld [vmem:[%s806_s2 + $0x18] sm:$0xff] }
   0x5   :  { %v644_v3 = vshrl.u32 %v30_v1, 7  ;;  %565 = vset.pattern.permute.xlu1 %v594_v4  ;;  %v29_v7 = vld [vmem:[%s804_s0] sm:$0xf]  ;;  %137 = vperm.xlu0 %564, %v131_v5  }
   0x6   :  { %147 = vperm.xlu1 %565, %v133_v6  }
   0x7   :  { %v32_v8 = vadd.s32 8, %v644_v3  ;;  %v41_v9 = vsub.s32 0, %v644_v3  ;;  %v53_v10 = vsub.s32 1, %v644_v3  ;;  %v73_v11 = vsub.s32 2, %v644_v3 }
   0x8   :  { %v93_v14 = vsub.s32 3, %v644_v3 }
   0x9   :  { %v668_v15 = vrot.slane %v29_v7, %v41_v9  ;;  %v670_v16 = vrot.slane %v29_v7, %v53_v10  ;;  %v672_v17 = vrot.slane %v29_v7, %v73_v11  ;;  %142 = vperm.xlu0 %564, %v132_v12  }
   0xa   :  { %v674_v18 = vrot.slane %v29_v7, %v93_v14  ;;  %152 = vperm.xlu1 %565, %v134_v13  }
   0xb   :  { %14 = vsyncpa [#allocation4], 0  ;;  %vm43_vm1 = vcmp.eq.s32.totalorder %v644_v3, %v668_v15  ;;  %vm44_vm2 = vcmp.eq.s32.totalorder %v32_v8, %v668_v15  ;;  %vm55_vm3 = vcmp.eq.s32.totalorder %v644_v3, %v670_v16  ;;  %vm56_vm4 = vcmp.eq.s32.totalorder %v32_v8, %v670_v16  ;;  %v261_v19 = vld [vmem:[%s808_s4] sm:$0xff]  ;;  %v262_v21 = vld [vmem:[%s808_s4 + $0x8] sm:$0xff] }
   0xc   :  { %vm63_vm5 = vmor %vm43_vm1, %vm55_vm3  ;;  %vm75_vm6 = vcmp.eq.s32.totalorder %v644_v3, %v672_v17  ;;  %vm76_vm7 = vcmp.eq.s32.totalorder %v32_v8, %v672_v17  ;;  %v33_v20 = vadd.s32 16, %v644_v3  ;;  %vm95_vm9 = vcmp.eq.s32.totalorder %v644_v3, %v674_v18  ;;  %v263_v23 = vld [vmem:[%s808_s4 + $0x10] sm:$0xff]  ;;  %v264_v25 = vld [vmem:[%s808_s4 + $0x18] sm:$0xff] }
   0xd   :  { %vm64_vm8 = vmor %vm44_vm2, %vm56_vm4  ;;  %v34_v22 = vadd.s32 24, %v644_v3  ;;  %vm96_vm11 = vcmp.eq.s32.totalorder %v32_v8, %v674_v18  ;;  %267 = vperm.xlu0 %564, %v261_v19   ;;  %v595_v26 = vmov 1.0|1.0   ;;  %v35_v27 = vadd.s32 32, %v644_v3  ;;  %v387_v28 = vld [vmem:[%s809_s5] sm:$0xff]  ;;  %v388_v30 = vld [vmem:[%s809_s5 + $0x8] sm:$0xff] }
   0xe   :  { %vm83_vm10 = vmor %vm63_vm5, %vm75_vm6  ;;  %272 = vperm.xlu1 %565, %v262_v21   ;;  %vm45_vm14 = vcmp.eq.s32.totalorder %v33_v20, %v668_v15  ;;  %vm57_vm15 = vcmp.eq.s32.totalorder %v33_v20, %v670_v16  ;;  %vm77_vm5 = vcmp.eq.s32.totalorder %v33_v20, %v672_v17  ;;  %v36_v29 = vadd.s32 40, %v644_v3  ;;  %v389_v32 = vld [vmem:[%s809_s5 + $0x10] sm:$0xff]  ;;  %v390_v33 = vld [vmem:[%s809_s5 + $0x18] sm:$0xff] }
   0xf   :  { %vm84_vm12 = vmor %vm64_vm8, %vm76_vm7  ;;  %vm46_vm2 = vcmp.eq.s32.totalorder %v34_v22, %v668_v15  ;;  %vm58_vm3 = vcmp.eq.s32.totalorder %v34_v22, %v670_v16  ;;  %vm78_vm7 = vcmp.eq.s32.totalorder %v34_v22, %v672_v17  ;;  %v37_v34 = vadd.s32 48, %v644_v3  ;;  %v424_v36 = vld [vmem:[#allocation2] sm:$0x1]  ;;  %v128_v37 = vld [vmem:[%s805_s1 + $0x8] sm:$0xff] }
  0x10   :  { %vm699_vm13 = vmor %vm83_vm10, %vm95_vm9  ;;  %vm97_vm9 = vcmp.eq.s32.totalorder %v33_v20, %v674_v18  ;;  %v38_v35 = vadd.s32 56, %v644_v3  ;;  %v129_v38 = vld [vmem:[%s805_s1 + $0x10] sm:$0xff]  ;;  %v130_v39 = vld [vmem:[%s805_s1 + $0x18] sm:$0xff] }
  0x11   :  { %vm104_vm1 = vmor %vm84_vm12, %vm96_vm11  ;;  %277 = vperm.xlu0 %564, %v263_v23   ;;  %vm98_vm11 = vcmp.eq.s32.totalorder %v34_v22, %v674_v18  ;;  %vm81_vm0 = vcmp.eq.s32.totalorder %v37_v34, %v672_v17  ;;  %v257_v40 = vld [vmem:[%s807_s3] sm:$0xff]  ;;  %v258_v59 = vld [vmem:[%s807_s3 + $0x8] sm:$0xff] }
  0x12   :  { %vm537_vm4 = vmpackc.low %vm104_vm1, %vm699_vm13  ;;  %282 = vperm.xlu1 %565, %v264_v25   ;;  %v259_v60 = vld [vmem:[%s807_s3 + $0x10] sm:$0xff]  ;;  %v260_v61 = vld [vmem:[%s807_s3 + $0x18] sm:$0xff]  ;;  %s596_s3 = smov [#allocation3]  }
  0x13   :  { %538 = vmatprep.subr.msk.bf16.mxu0 %vm537_vm4, %v595_v26  ;;  %vm65_vm6 = vmor %vm45_vm14, %vm57_vm15  ;;  %vm47_vm14 = vcmp.eq.s32.totalorder %v35_v27, %v668_v15  ;;  %vm59_vm15 = vcmp.eq.s32.totalorder %v35_v27, %v670_v16  ;;  %s448_s2 = sshll.u32 %s596_s3, 4  ;;  %s449_s2 = int_to_ptr.vmem [resolvable:$true] %s448_s2 }
  0x14   :  { %540 = vmatpush3.bf16.msk.msra.mxu0 %vm537_vm4, %v595_v26  ;;  %vm66_vm8 = vmor %vm46_vm2, %vm58_vm3  ;;  %vm48_vm2 = vcmp.eq.s32.totalorder %v36_v29, %v668_v15  ;;  %vm60_vm3 = vcmp.eq.s32.totalorder %v36_v29, %v670_v16  ;;  %s570_s14 = scalar_lea.vmem %s449_s2, 16  ;;  %s574_s15 = scalar_lea.vmem %s449_s2, 32 }
  0x15   :  { %vm85_vm10 = vmor %vm65_vm6, %vm77_vm5  ;;  %393 = vperm.xlu0 %564, %v387_v28   ;;  %vm79_vm5 = vcmp.eq.s32.totalorder %v35_v27, %v672_v17  ;;  %p571_p0 = scmp.ne.s32.totalorder %s449_s2, %s570_s14  ;;  %p575_p1 = scmp.lt.s32.totalorder %s449_s2, %s449_s2 }
  0x16   :  { %vm86_vm12 = vmor %vm66_vm8, %vm78_vm7  ;;  %398 = vperm.xlu1 %565, %v388_v30   ;;  %vm80_vm7 = vcmp.eq.s32.totalorder %v36_v29, %v672_v17  ;;  %p576_p2 = scmp.lt.s32.totalorder %s574_s15, %s570_s14 }
  0x17   :  { %vm726_vm13 = vmor %vm85_vm10, %vm97_vm9  ;;  %vm99_vm9 = vcmp.eq.s32.totalorder %v35_v27, %v674_v18 }
  0x18   :  { %vm106_vm1 = vmor %vm86_vm12, %vm98_vm11  ;;  %vm100_vm11 = vcmp.eq.s32.totalorder %v36_v29, %v674_v18  ;;  %p577_p3 = por %p576_p2, %p575_p1 }
  0x19   :  { %vm541_vm4 = vmpackc.low %vm106_vm1, %vm726_vm13  ;;  %403 = vperm.xlu0 %564, %v389_v32  }
  0x1a   :  { %542 = vmatprep.subr.msk.bf16.mxu0 %vm541_vm4, %v595_v26  ;;  %vm67_vm6 = vmor %vm47_vm14, %vm59_vm15  ;;  %408 = vperm.xlu1 %565, %v390_v33   ;;  %vm49_vm14 = vcmp.eq.s32.totalorder %v37_v34, %v668_v15  ;;  %vm61_vm15 = vcmp.eq.s32.totalorder %v37_v34, %v670_v16  ;;  %p578_p4 = pnand %p577_p3, %p571_p0 }
  0x1b   :  { %544 = vmatpush3.bf16.msk.msra.mxu0 %vm541_vm4, %v595_v26  ;;  %vm68_vm8 = vmor %vm48_vm2, %vm60_vm3  ;;  %vm50_vm4 = vcmp.eq.s32.totalorder %v38_v35, %v668_v15  ;;  %vm62_vm2 = vcmp.eq.s32.totalorder %v38_v35, %v670_v16 }
  0x1c   :  { %vm87_vm10 = vmor %vm67_vm6, %vm79_vm5  ;;  %vm82_vm6 = vcmp.eq.s32.totalorder %v38_v35, %v672_v17 }
  0x1d   :  { %vm88_vm12 = vmor %vm68_vm8, %vm80_vm7  ;;  %427 = vperm.xlu0 %564, %v424_v36   ;;  %vm101_vm8 = vcmp.eq.s32.totalorder %v37_v34, %v674_v18 }
  0x1e   :  { %vm107_vm13 = vmor %vm87_vm10, %vm99_vm9  ;;  %vm102_vm10 = vcmp.eq.s32.totalorder %v38_v35, %v674_v18 }
  0x1f   :  { %vm108_vm1 = vmor %vm88_vm12, %vm100_vm11 }
  0x20   :  { %vm545_vm3 = vmpackc.low %vm108_vm1, %vm107_vm13 }
  0x21   :  { %546 = vmatprep.subr.msk.bf16.mxu0 %vm545_vm3, %v595_v26  ;;  %vm69_vm5 = vmor %vm49_vm14, %vm61_vm15  ;;  %vm817_vm14 = vcmask 523264  }
  0x22   :  { %548 = vmatpush3.bf16.msk.msra.mxu0 %vm545_vm3, %v595_v26  ;;  %vm70_vm7 = vmor %vm50_vm4, %vm62_vm2  ;;  %vm285_vm4 = vcmask 261120  }
  0x23   :  { %vm89_vm9 = vmor %vm69_vm5, %vm81_vm0  ;;  %531 = vmatprep.mubr.msk.f32.mxu1 %vm285_vm4, %v257_v40 }
  0x24   :  { %vm90_vm11 = vmor %vm70_vm7, %vm82_vm6 }
  0x25   :  { %vm109_vm12 = vmor %vm89_vm9, %vm101_vm8 }
  0x26   :  { %vm110_vm1 = vmor %vm90_vm11, %vm102_vm10 }
  0x27   :  { %vm549_vm13 = vmpackc.low %vm110_vm1, %vm109_vm12 }
  0x28   :  { %550 = vmatprep.subr.msk.bf16.mxu0 %vm549_vm13, %v595_v26  ;;  %vm818_vm0 = vmmov %vm817_vm14 }
  0x29   :  { %552 = vmatpush3.bf16.msk.msra.mxu0 %vm549_vm13, %v595_v26  ;;  %vm819_vm15 = vmmov %vm818_vm0 }
  0x2c   :  { %518 = vmatmul.mubr.msk.f32.vlgmr.msra.gmra.mrb[0].mxu0 %vm817_vm14, %v128_v37 }
  0x2d   :  { %520 = vmatprep.mubr.msk.f32.mxu0 %vm818_vm0, %v129_v38 }
  0x30   :  { %521 = vmatmul.mubr.msk.f32.gmra.mrb[2].mxu0 %vm819_vm15, %v130_v39 }
  0x84   :  { %v138_v41 = vpop.permute.xlu0 %137 }
  0x85   :  { %v148_v42 = vpop.permute.xlu1 %147 }
  0x88   :  { %v143_v43 = vpop.permute.xlu0 %142 }
  0x89   :  { %v153_v49 = vpop.permute.xlu1 %152 }
  0x8c   :  { %v268_v62 = vpop.permute.xlu0 %267 }
  0x8d   :  { %v273_v63 = vpop.permute.xlu1 %272 }
  0x90   :  { %v278_v0 = vpop.permute.xlu0 %277 }
  0x91   :  { %v283_v1 = vpop.permute.xlu1 %282 }
  0x94   :  { %v394_v7 = vpop.permute.xlu0 %393 }
  0x95   :  { %v399_v10 = vpop.permute.xlu1 %398 }
  0x98   :  { %v404_v21 = vpop.permute.xlu0 %403 }
  0x99   :  { %v409_v23 = vpop.permute.xlu1 %408 }
  0x9c   :  { %v428_v31 = vpop.permute.xlu0 %427 }
  0x9d   :  { %v433_v33 = vrot.slane %v428_v31, %v41_v9 }
  0xff   :  { %v519_v44 = vpop.f32.mrb[0].mxu0 }
 0x100   :  { %v240_v45 = vadd.f32 %v519_v44, %v143_v43  ;;  %v234_v46 = vpop.f32.mrb[1].mxu0 }
 0x101   :  { %v235_v47 = vadd.f32 %v234_v46, %v138_v41 }
 0x102   :  { %v254_v48 = vmax.f32 %v240_v45, 0.0 }
 0x103   :  { %v253_v50 = vmax.f32 %v235_v47, 0.0  ;;  %v522_v51 = vpop.f32.mrb[2].mxu0 }
 0x104   :  { %v250_v52 = vadd.f32 %v522_v51, %v153_v49  ;;  %v244_v53 = vpop.f32.mrb[3].mxu0 }
 0x105   :  { %v245_v54 = vadd.f32 %v244_v53, %v148_v42  ;;  %v553_v55 = vpack.c.bf16 %v254_v48, %v253_v50 }
 0x106   :  { %v256_v56 = vmax.f32 %v250_v52, 0.0 }
 0x107   :  { %v255_v57 = vmax.f32 %v245_v54, 0.0  ;;  %554 = vmatprep.subr.bf16.mxu1 %v553_v55 }
 0x108   :  { %556 = vmatpush3.bf16.msra.mxu1 %v553_v55 }
 0x109   :  { %v557_v58 = vpack.c.bf16 %v256_v56, %v255_v57 }
 0x10b   :  { %558 = vmatprep.subr.bf16.mxu1 %v557_v58 }
 0x10c   :  { %560 = vmatpush3.bf16.msra.mxu1 %v557_v58 }
 0x10f   :  { %532 = vmatmul.mubr.msk.f32.vlgmr.msra.gmra.mrb[0].mxu1 %vm285_vm4, %v258_v59 }
 0x110   :  { %534 = vmatprep.mubr.msk.f32.mxu1 %vm285_vm4, %v259_v60 }
 0x113   :  { %535 = vmatmul.mubr.msk.f32.gmra.mrb[2].mxu1 %vm285_vm4, %v260_v61 }
 0x1e2   :  { %v533_v2 = vpop.f32.mrb[0].mxu1 }
 0x1e3   :  { %v370_v4 = vadd.f32 %v533_v2, %v273_v63  ;;  %v364_v5 = vpop.f32.mrb[1].mxu1 }
 0x1e4   :  { %v365_v6 = vadd.f32 %v364_v5, %v268_v62 }
 0x1e5   :  { %v384_v8 = vmax.f32 %v370_v4, 0.0 }
 0x1e6   :  { %v383_v11 = vmax.f32 %v365_v6, 0.0  ;;  %v536_v12 = vpop.f32.mrb[2].mxu1 }
 0x1e7   :  { %v412_v13 = vmul.f32 %v399_v10, %v384_v8  ;;  %v380_v14 = vadd.f32 %v536_v12, %v283_v1  ;;  %v374_v15 = vpop.f32.mrb[3].mxu1 }
 0x1e8   :  { %v411_v16 = vmul.f32 %v394_v7, %v383_v11  ;;  %v375_v17 = vadd.f32 %v374_v15, %v278_v0 }
 0x1e9   :  { %v386_v19 = vmax.f32 %v380_v14, 0.0 }
 0x1ea   :  { %v415_v18 = vadd.f32 %v412_v13, %v411_v16  ;;  %v385_v20 = vmax.f32 %v375_v17, 0.0 }
 0x1eb   :  { %v414_v24 = vmul.f32 %v409_v23, %v386_v19 }
 0x1ec   :  { %v413_v22 = vmul.f32 %v404_v21, %v385_v20 }
 0x1ee   :  { %v416_v25 = vadd.f32 %v415_v18, %v413_v22 }
 0x1f0   :  { %v417_v26 = vadd.f32 %v416_v25, %v414_v24 }
 0x1f2   :  { %v418_v27 = vrot.slane %v417_v26, 4 }
 0x1f4   :  { %v419_v28 = vadd.f32 %v418_v27, %v417_v26 }
 0x1f6   :  { %v420_v29 = vrot.slane %v419_v28, 2 }
 0x1f8   :  { %v421_v30 = vadd.f32 %v420_v29, %v419_v28 }
 0x1fa   :  { %v422_v32 = vrot.slane %v421_v30, 1 }
 0x1fc   :  { %v423_v34 = vadd.f32 %v422_v32, %v421_v30 }
 0x1fe   :  { %v434_v35 = vadd.f32 %v433_v33, %v423_v34 }
 0x200   :  { %v480_v36 = vmul.f32 -1.442695, %v434_v35 }
 0x202   :  { %566 = vpow2.f32 %v480_v36 }
 0x20c   :  { %v567_v37 = vpop.eup %566 }
 0x20d   :  { %v438_v38 = vadd.f32 1.0, %v567_v37 }
 0x20f   :  { %568 = vrcp.f32 %v438_v38 }
 0x219   :  { %v569_v39 = vpop.eup %568 }
 0x21a   :  { %441 = vst [vmem:[#allocation3] sm:$0x1] %v569_v39 }
 0x21b   :  { %581 = shalt.err (!%p578_p4)
}
 0x21c   :  { %s582_s18 = scalar_lea.hbm %s811_s7, 16 }
 0x21d   :  { %p583_p5 = scmp.ne.s32.totalorder %s811_s7, %s582_s18  ;;  %p586_p6 = scmp.lt.u32.totalorder %s582_s18, %s811_s7 }
 0x21f   :  { %p588_p7 = pnand %p586_p6, %p583_p5 }
 0x221   :  { %591 = shalt.err (!%p588_p7)
}
 0x222   :  { %451 = dma.vmem_to_hbm [thread:$0]  %s449_s2, 16, %s811_s7, [#allocation4]  }
 0x223   :  { %592 = dma.done.wait [#allocation4], 16  }
 0x224   :  { %593 = vsyncadd [#allocation4], 4294967280 }
 0x225   :  { %455 = vsyncpa [#allocation4], 1 }

</bundles_post_ra>
